<compile_context>
chip_gen: v7x
topology: tpu7x:2x2x1
jax: 0.10.0
libtpu: 0.0.40
codegen_flags: <defaults>
</compile_context>

<pallas_src>
import functools

import numpy as np
import jax
import jax.numpy as jnp
from jax import lax
from jax.experimental import pallas as pl
from jax.experimental.pallas import tpu as pltpu

_EPS = 1e-5
_F32 = jnp.float32
_BF16 = jnp.bfloat16


def _cdiv(a, b):
    return -(-a // b)


def _round_up(a, b):
    return _cdiv(a, b) * b


def _bspec(shape, index_map, *, single_buffer=False):
    """BlockSpec; grid-invariant operands get a single VMEM buffer when supported."""
    if single_buffer:
        try:
            return pl.BlockSpec(shape, index_map, pipeline_mode=pl.Buffered(1))
        except Exception:  # pragma: no cover - jax without pipeline_mode kwarg
            pass
    return pl.BlockSpec(shape, index_map)


def _compiler_params(dim_sem, est_bytes):
    """Explicit scoped-VMEM limit sized from the tile bytes (with headroom)."""
    limit = int(min(max(1.5 * est_bytes, 16 * 2**20), 100 * 2**20))
    return pltpu.CompilerParams(dimension_semantics=dim_sem,
                                vmem_limit_bytes=limit)


# ----------------------------------------------------------------------------
# pltpu.roll direction calibration (run once, outside jit).
# ----------------------------------------------------------------------------
_ROLL_SIGN = None


def calibrate_roll_sign():
    """Determine pltpu.roll's rotation convention with a tiny probe kernel."""
    global _ROLL_SIGN
    if _ROLL_SIGN is None:
        def probe(x_ref, o_ref):
            o_ref[...] = pltpu.roll(x_ref[...], 1, axis=1)

        x = jnp.tile(jnp.arange(128, dtype=_F32)[None, :], (8, 1))
        y = pl.pallas_call(probe,
                           out_shape=jax.ShapeDtypeStruct((8, 128), _F32))(x)
        # jnp.roll convention: out[j] = in[(j - shift) % n]  ->  y[0, 0] == 127
        _ROLL_SIGN = 1 if int(y[0, 0]) == 127 else -1
    return _ROLL_SIGN


# ----------------------------------------------------------------------------
# Kernel 1: transform1d == Conv1d(1, K, K, stride=hop) + ReLU + BN1 statistics.
# The framed matmul is decomposed into R = K//hop sublane-shifted chunk matmuls
# so the overlapping frames are never materialised in HBM.
# ----------------------------------------------------------------------------
def _transform_kernel(xc_ref, w_ref, b_ref, o_ref, st_ref, *, n_frames, n_sub,
                      n_bins):
    F, R, K = n_frames, n_sub, n_bins
    xall = xc_ref[0]                                     # (C, hop) f32
    acc = jnp.zeros((F, K), _F32)
    for r in range(R):
        rows = xall[r:r + F, :].astype(_BF16)            # sublane-shifted window
        acc = acc + jnp.dot(rows, w_ref[r], preferred_element_type=_F32)
    y = jnp.maximum(acc + b_ref[...], 0.0)               # ReLU
    o_ref[0] = y.astype(o_ref.dtype)
    # partial BatchNorm1d statistics (per feature, summed over this batch's frames)
    st_ref[0, 0:1, :] = jnp.sum(y, axis=0, keepdims=True)
    st_ref[0, 1:2, :] = jnp.sum(y * y, axis=0, keepdims=True)


def transform_conv1d(x, w1, b1, *, K, hop):
    """Returns h1 (B, F, K) bf16 and (2, K) f32 [sum, sum_sq] batch statistics."""
    B, T = x.shape
    F = (T - K) // hop + 1
    R = K // hop
    C = F - 1 + R                                        # hop-chunks covering all frames
    xc = x[:, :C * hop].reshape(B, C, hop).astype(_F32)
    # weight slabs: slab r holds kernel taps [r*hop, (r+1)*hop) for all K outputs
    w_slab = jnp.transpose(w1).reshape(R, hop, K).astype(_BF16)
    bias = b1.reshape(1, K).astype(_F32)

    est = (C * hop * 4) * 2 + R * hop * K * 2 + K * 4 \
        + (F * K * 2 + 2 * K * 4) * 2 + F * K * 4 * 2
    h1, stats = pl.pallas_call(
        functools.partial(_transform_kernel, n_frames=F, n_sub=R, n_bins=K),
        out_shape=(jax.ShapeDtypeStruct((B, F, K), _BF16),
                   jax.ShapeDtypeStruct((B, 2, K), _F32)),
        grid_spec=pltpu.PrefetchScalarGridSpec(
            num_scalar_prefetch=0,
            grid=(B,),
            in_specs=[
                pl.BlockSpec((1, C, hop), lambda b: (b, 0, 0)),
                _bspec((R, hop, K), lambda b: (0, 0, 0), single_buffer=True),
                _bspec((1, K), lambda b: (0, 0), single_buffer=True),
            ],
            out_specs=[
                pl.BlockSpec((1, F, K), lambda b: (b, 0, 0)),
                pl.BlockSpec((1, 2, K), lambda b: (b, 0, 0)),
            ],
        ),
        compiler_params=_compiler_params(("parallel",), est),
    )(xc, w_slab, bias)
    return h1, jnp.sum(stats, axis=0)                    # (2, K)


# ----------------------------------------------------------------------------
# Kernel 2: BN1-fold + Conv2d(1, CH, 7, padding=3) + ReLU + BN2 statistics.
# Bin-axis taps via 7 lane rolls (XLU), frame-axis taps via sublane windows of
# a frame-padded value; 49 per-channel FMAs on the VPU (weights pre-broadcast
# to (1, K) rows).  No banded (K, K) matrices, no wrapper-side pad.
# ----------------------------------------------------------------------------
def _smooth_conv_kernel(h1_ref, sc_ref, wr_ref, o_ref, st_ref, *, n_frames,
                        n_bins, n_ch, ksize, roll_sign):
    F, K, CH, KS = n_frames, n_bins, n_ch, ksize
    P = KS // 2
    Fp = F + 2 * P
    # BatchNorm1d (batch stats) folded into the conv input
    xn = h1_ref[0].astype(_F32) * sc_ref[0:1, :] + sc_ref[1:2, :]        # (F, K)
    pad = jnp.concatenate(
        [jnp.zeros((P, K), _F32), xn, jnp.zeros((P, K), _F32)], axis=0)  # (Fp, K)
    # 7 lane-shifted, zero-filled copies (bin-axis taps)
    lane = lax.broadcasted_iota(jnp.int32, (Fp, K), 1)
    shifted = []
    for ih in range(KS):
        d = ih - P
        if d == 0:
            r = pad
        else:
            r = pltpu.roll(pad, (-d * roll_sign) % K, axis=1)
            if d > 0:
                r = jnp.where(lane < K - d, r, 0.0)
            else:
                r = jnp.where(lane >= -d, r, 0.0)
        shifted.append(r)
    # channels outermost: one live accumulator, store each channel when done
    nw = CH * KS * KS
    for n in range(CH):
        b_row = wr_ref[nw + n:nw + n + 1, :]                             # (1, K)
        acc = jnp.zeros((F, K), _F32) + b_row
        for ih in range(KS):
            win_src = shifted[ih]
            for iw in range(KS):
                w_row = wr_ref[(n * KS + ih) * KS + iw:
                               (n * KS + ih) * KS + iw + 1, :]           # (1, K)
                acc = acc + w_row * win_src[iw:iw + F, :]
        y = jnp.maximum(acc, 0.0)
        o_ref[0, :, n * K:(n + 1) * K] = y.astype(o_ref.dtype)
        st_ref[0, n:n + 1, :] = jnp.sum(y, axis=0, keepdims=True)
        st_ref[0, CH + n:CH + n + 1, :] = jnp.sum(y * y, axis=0, keepdims=True)


def smooth_conv2d(h1, scale1, shift1, w_sm, b_sm):
    """Returns h2 (B, F, CH*K) bf16 (torch permute(0,3,1,2).view layout) and
    per-channel (sum, sum_sq) batch statistics."""
    B, F, K = h1.shape
    CH, _, KH, KW = w_sm.shape
    sc = jnp.stack([scale1, shift1], axis=0).astype(_F32)                # (2, K)
    wb_scalars = jnp.concatenate(
        [w_sm.reshape(CH * KH * KW), b_sm.reshape(CH)]).astype(_F32)
    wrows = jnp.repeat(wb_scalars[:, None], K, axis=1)                   # (CH*49+CH, K)
    roll_sign = _ROLL_SIGN if _ROLL_SIGN is not None else 1

    est = (F * K * 2 + 2 * K * 4) * 2 + wrows.size * 4 \
        + (F * CH * K * 2 + 2 * CH * K * 4) * 2 + (F + KH) * K * 4 * 10
    h2, stats = pl.pallas_call(
        functools.partial(_smooth_conv_kernel, n_frames=F, n_bins=K, n_ch=CH,
                          ksize=KH, roll_sign=roll_sign),
        out_shape=(jax.ShapeDtypeStruct((B, F, CH * K), _BF16),
                   jax.ShapeDtypeStruct((B, 2 * CH, K), _F32)),
        grid_spec=pltpu.PrefetchScalarGridSpec(
            num_scalar_prefetch=0,
            grid=(B,),
            in_specs=[
                pl.BlockSpec((1, F, K), lambda b: (b, 0, 0)),
                _bspec((2, K), lambda b: (0, 0), single_buffer=True),
                _bspec((CH * KH * KW + CH, K), lambda b: (0, 0),
                       single_buffer=True),
            ],
            out_specs=[
                pl.BlockSpec((1, F, CH * K), lambda b: (b, 0, 0)),
                pl.BlockSpec((1, 2 * CH, K), lambda b: (b, 0, 0)),
            ],
        ),
        compiler_params=_compiler_params(("parallel",), est),
    )(h1, sc, wrows)
    # TODO(synk): tile the frame axis (with halo) for very long signals.
    s = jnp.sum(stats, axis=(0, 2))                                      # (2*CH,)
    return h2, s[:CH], s[CH:]


# ----------------------------------------------------------------------------
# Kernel 3: fused (x * scale + shift) @ W + b (+ ReLU) with optional per-column
# (sum, sum_sq) partial statistics.  Row tiling (padded M), optional N tiling.
# ----------------------------------------------------------------------------
def _affine_matmul_kernel(x_ref, s_ref, t_ref, w_ref, b_ref, *out_refs,
                          relu, tm, m_valid, need_mask, stats):
    o_ref = out_refs[0]
    xn = (x_ref[...].astype(_F32) * s_ref[...] + t_ref[...]).astype(_BF16)
    y = jnp.dot(xn, w_ref[...], preferred_element_type=_F32) + b_ref[...]
    if relu:
        y = jnp.maximum(y, 0.0)
    o_ref[...] = y.astype(o_ref.dtype)
    if stats:
        st_ref = out_refs[1]
        if need_mask:
            row = lax.broadcasted_iota(jnp.int32, y.shape, 0) + pl.program_id(1) * tm
            valid = row < m_valid
            ys = jnp.where(valid, y, 0.0)
            ysq = jnp.where(valid, y * y, 0.0)
        else:
            ys, ysq = y, y * y
        st_ref[0, 0:1, :] = jnp.sum(ys, axis=0, keepdims=True)
        st_ref[0, 1:2, :] = jnp.sum(ysq, axis=0, keepdims=True)


def affine_matmul(x, w, b, scale=None, shift=None, *, relu=False, stats=False,
                  block_m=512, block_n=1024, out_dtype=_BF16):
    """out = act((x * scale + shift) @ w + b); optionally also (2, N) stats."""
    M, Kin = x.shape
    Kw, N = w.shape
    assert Kin == Kw
    if scale is None:
        scale = jnp.ones((Kin,), _F32)
    if shift is None:
        shift = jnp.zeros((Kin,), _F32)
    scale = scale.reshape(1, Kin).astype(_F32)
    shift = shift.reshape(1, Kin).astype(_F32)

    # row tiling: bf16-aligned, >=2 row tiles when possible (both v7x TCs busy)
    align = 16
    tm = align if M <= align else min(block_m, _round_up(_cdiv(M, 2), align))
    m_pad = _round_up(M, tm)
    # column tiling: bound the resident weight block
    tn = N if N <= block_n else block_n
    n_pad = _round_up(N, tn)

    xb = x.astype(_BF16)
    if m_pad != M:
        xb = jnp.pad(xb, ((0, m_pad - M), (0, 0)))
    wb = w.astype(_BF16)
    bias = b.reshape(1, N).astype(_F32)
    if n_pad != N:
        wb = jnp.pad(wb, ((0, 0), (0, n_pad - N)))
        bias = jnp.pad(bias, ((0, 0), (0, n_pad - N)))

    grid = (n_pad // tn, m_pad // tm)           # rows on the fast (inner) axis
    if stats:
        out_shape = (jax.ShapeDtypeStruct((m_pad, n_pad), out_dtype),
                     jax.ShapeDtypeStruct((m_pad // tm, 2, n_pad), _F32))
        out_specs = (pl.BlockSpec((tm, tn), lambda j, i: (i, j)),
                     pl.BlockSpec((1, 2, tn), lambda j, i: (i, 0, j)))
    else:
        out_shape = jax.ShapeDtypeStruct((m_pad, n_pad), out_dtype)
        out_specs = pl.BlockSpec((tm, tn), lambda j, i: (i, j))

    est = (tm * Kin * 2 + tm * tn * 2 + 2 * tn * 4) * 2 \
        + (Kin * tn * 2 + tn * 4) * 2 + 2 * Kin * 4 * 2 + tm * tn * 4 * 2
    kernel = functools.partial(_affine_matmul_kernel, relu=relu, tm=tm,
                               m_valid=M, need_mask=(m_pad != M), stats=stats)
    res = pl.pallas_call(
        kernel,
        out_shape=out_shape,
        grid_spec=pltpu.PrefetchScalarGridSpec(
            num_scalar_prefetch=0,
            grid=grid,
            in_specs=[
                pl.BlockSpec((tm, Kin), lambda j, i: (i, 0)),
                _bspec((1, Kin), lambda j, i: (0, 0), single_buffer=True),
                _bspec((1, Kin), lambda j, i: (0, 0), single_buffer=True),
                pl.BlockSpec((Kin, tn), lambda j, i: (0, j)),
                pl.BlockSpec((1, tn), lambda j, i: (0, j)),
            ],
            out_specs=out_specs,
        ),
        compiler_params=_compiler_params(("parallel", "parallel"), est),
    )(xb, scale, shift, wb, bias)
    if stats:
        out, st = res
        return out[:M, :N], jnp.sum(st, axis=0)[:, :N]
    return res[:M, :N]


# ----------------------------------------------------------------------------
# Kernel 4: ConvTranspose1d(K, 1, K, stride=hop) == per-frame matmuls + in-kernel
# overlap-add into hop-sized output chunks (no dense w_comb matrix).
# ----------------------------------------------------------------------------
def _overlap_add_kernel(h4_ref, w_ref, b_ref, o_ref, *, n_frames, n_sub):
    F, R = n_frames, n_sub
    C, hop = o_ref.shape[1], o_ref.shape[2]
    o_ref[0] = jnp.zeros((C, hop), _F32)
    for r in range(R):
        v = jnp.dot(h4_ref[0], w_ref[r], preferred_element_type=_F32)   # (F, hop)
        o_ref[0, r:r + F, :] = o_ref[0, r:r + F, :] + v
    o_ref[0] = o_ref[0] + b_ref[...]


def conv_transpose_oa(h4, w_ct, b_ct, *, K, hop):
    """h4 (B, F, K) -> overlap-added signal (B, (F-1)*hop + K) f32."""
    B, F, _ = h4.shape
    R = K // hop
    C = F - 1 + R
    w_split = w_ct.reshape(K, R, hop).transpose(1, 0, 2).astype(_BF16)   # (R, K, hop)
    bias_row = jnp.full((1, hop), b_ct, _F32)

    est = (F * K * 2 + C * hop * 4) * 2 + R * K * hop * 2 + hop * 4 + F * hop * 4 * 2
    out = pl.pallas_call(
        functools.partial(_overlap_add_kernel, n_frames=F, n_sub=R),
        out_shape=jax.ShapeDtypeStruct((B, C, hop), _F32),
        grid_spec=pltpu.PrefetchScalarGridSpec(
            num_scalar_prefetch=0,
            grid=(B,),
            in_specs=[
                pl.BlockSpec((1, F, K), lambda b: (b, 0, 0)),
                _bspec((R, K, hop), lambda b: (0, 0, 0), single_buffer=True),
                _bspec((1, hop), lambda b: (0, 0), single_buffer=True),
            ],
            out_specs=pl.BlockSpec((1, C, hop), lambda b: (b, 0, 0)),
        ),
        compiler_params=_compiler_params(("parallel",), est),
    )(h4, w_split, bias_row)
    return out.reshape(B, C * hop)


# ----------------------------------------------------------------------------
# Full forward pass (train-mode BatchNorm with default gamma=1, beta=0).
# ----------------------------------------------------------------------------
def _stats_to_scale_shift(st, count):
    mean = st[0] / count
    var = st[1] / count - mean * mean
    scale = lax.rsqrt(var + _EPS)
    return scale, -mean * scale


def separation_network_forward(x, params, *, transform_size, hop, num_channels):
    K, CH = transform_size, num_channels
    B, T = x.shape
    F = (T - K) // hop + 1
    x = x.astype(_F32)

    # ---- transform1d + ReLU (+ BN1 batch statistics, fused)
    if K % hop == 0:
        h1, st1 = transform_conv1d(x, params["w1"], params["b1"], K=K, hop=hop)
    else:
        # TODO(synk): general-hop path still materialises the framed signal.
        idx = jnp.arange(F)[:, None] * hop + jnp.arange(K)[None, :]
        frames = x[:, idx].reshape(B * F, K)
        h1f, st1 = affine_matmul(frames, params["w1"].T, params["b1"],
                                 relu=True, stats=True)
        h1 = h1f.reshape(B, F, K)
    scale1, shift1 = _stats_to_scale_shift(st1, B * F)

    # ---- BN1-fold + smooth Conv2d + ReLU (+ BN2 statistics, fused)
    h2, sum2, ssq2 = smooth_conv2d(h1, scale1, shift1,
                                   params["w_sm"], params["b_sm"])
    n2 = B * F * K
    mean2 = sum2 / n2
    var2 = ssq2 / n2 - mean2 * mean2
    rsq2 = lax.rsqrt(var2 + _EPS)
    scale2 = jnp.repeat(rsq2, K)
    shift2 = jnp.repeat(-mean2 * rsq2, K)

    # ---- linear1 + ReLU (BN2 folded in), BN3 statistics fused
    h3, st3 = affine_matmul(h2.reshape(B * F, CH * K),
                            params["w_l1"], params["b_l1"],
                            scale=scale2, shift=shift2, relu=True, stats=True)
    scale3, shift3 = _stats_to_scale_shift(st3, B * F)

    # ---- linear2 (BN3 folded in)
    h4 = affine_matmul(h3, params["w_l2"], params["b_l2"],
                       scale=scale3, shift=shift3, relu=False)

    # ---- conv_transpose (overlap-add)
    if K % hop == 0:
        y = conv_transpose_oa(h4.reshape(B, F, K), params["w_ct"],
                              params["b_ct"], K=K, hop=hop)
    else:
        # TODO(synk): general-hop overlap-add falls back to an XLA scatter-add.
        V = affine_matmul(h4, params["w_ct"], jnp.zeros((K,), _F32),
                          out_dtype=_F32).reshape(B, F, K)
        T_out = (F - 1) * hop + K
        y = jnp.zeros((B, T_out), _F32)
        for f in range(F):
            y = y.at[:, f * hop:f * hop + K].add(V[:, f])
        y = y + params["b_ct"]
    return y


# ----------------------------------------------------------------------------
# Parameters (FFT init for the transform / transpose weights, as in the module).
# ----------------------------------------------------------------------------
def init_params(key, *, transform_size, hop, num_channels):
    K, CH = transform_size, num_channels
    window = np.sqrt(np.hanning(K))
    fft = np.fft.fft(np.eye(K))
    fft = np.vstack((np.real(fft[: K // 2, :]), np.imag(fft[: K // 2, :])))
    w1 = (window * fft).astype(np.float32)                       # (K_out, K_pos)
    w_ct = (window * np.linalg.pinv(fft).T).astype(np.float32)   # (K_in, K_pos)

    ks = jax.random.split(key, 8)

    def u(kk, shape, fan_in):
        b = 1.0 / np.sqrt(fan_in)
        return jax.random.uniform(kk, shape, jnp.float32, -b, b)

    return {
        "w1": jnp.asarray(w1),
        "b1": u(ks[0], (K,), K),
        "w_sm": u(ks[1], (CH, 1, 7, 7), 49),
        "b_sm": u(ks[2], (CH,), 49),
        "w_l1": u(ks[3], (CH * K, 2 * K), CH * K),   # stored (in, out)
        "b_l1": u(ks[4], (2 * K,), CH * K),
        "w_l2": u(ks[5], (2 * K, K), 2 * K),
        "b_l2": u(ks[6], (K,), 2 * K),
        "w_ct": jnp.asarray(w_ct),
        "b_ct": u(ks[7], (), K),
    }


# ----------------------------------------------------------------------------
# Pure-JAX f32 reference (lax convs + explicit overlap-add) for verification.
# ----------------------------------------------------------------------------
def _reference_forward(x, params, *, transform_size, hop, num_channels, eps=_EPS):
    K, CH = transform_size, num_channels
    B, _ = x.shape
    hi = lax.Precision.HIGHEST

    def bn(v, axes):
        m = jnp.mean(v, axis=axes, keepdims=True)
        s = jnp.var(v, axis=axes, keepdims=True)
        return (v - m) / jnp.sqrt(s + eps)

    h = lax.conv_general_dilated(x[:, None, :], params["w1"][:, None, :], (hop,),
                                 "VALID", dimension_numbers=("NCH", "OIH", "NCH"),
                                 precision=hi)
    h = jnp.maximum(h + params["b1"][None, :, None], 0.0)        # (B, K, F)
    h = bn(h, (0, 2))
    F = h.shape[-1]

    h2 = lax.conv_general_dilated(h[:, None, :, :], params["w_sm"], (1, 1),
                                  [(3, 3), (3, 3)],
                                  dimension_numbers=("NCHW", "OIHW", "NCHW"),
                                  precision=hi)
    h2 = jnp.maximum(h2 + params["b_sm"][None, :, None, None], 0.0)
    h2 = bn(h2, (0, 2, 3))                                       # (B, CH, K, F)

    h3 = jnp.transpose(h2, (0, 3, 1, 2)).reshape(B, F, CH * K)
    h3 = jnp.maximum(jnp.dot(h3, params["w_l1"], precision=hi) + params["b_l1"], 0.0)
    h3 = bn(h3, (0, 1))
    h4 = jnp.dot(h3, params["w_l2"], precision=hi) + params["b_l2"]   # (B, F, K)

    V = jnp.einsum("bfc,ck->bfk", h4, params["w_ct"], precision=hi)
    T_out = (F - 1) * hop + K
    out = jnp.zeros((B, T_out), jnp.float32)
    for f in range(F):
        out = out.at[:, f * hop:f * hop + K].add(V[:, f])
    return out + params["b_ct"]


if __name__ == "__main__":
    # Scaled-down analogue of the defaults (transform_size=1024, hop=256, CH=3).
    transform_size = 128
    hop = 32
    num_channels = 3
    batch = 2
    n_frames = 16
    T = transform_size + (n_frames - 1) * hop          # 608 samples

    calibrate_roll_sign()                              # outside jit, once

    key = jax.random.PRNGKey(0)
    kx, kp = jax.random.split(key)
    x = jax.random.normal(kx, (batch, T), dtype=jnp.float32)
    params = init_params(kp, transform_size=transform_size, hop=hop,
                         num_channels=num_channels)

    fwd = functools.partial(separation_network_forward,
                            transform_size=transform_size, hop=hop,
                            num_channels=num_channels)
    out = jax.block_until_ready(jax.jit(fwd)(x, params))
    ref = jax.block_until_ready(_reference_forward(
        x, params, transform_size=transform_size, hop=hop,
        num_channels=num_channels))

    assert out.shape == ref.shape, (out.shape, ref.shape)
    # bf16 activations/weights with f32 accumulation vs. a pure-f32 reference:
    # compare with a relative-Frobenius tolerance instead of elementwise 1e-3.
    rel = float(jnp.linalg.norm(out - ref) / (jnp.linalg.norm(ref) + 1e-6))
    assert rel < 5e-2, rel
    print("KERNEL_OK")
</pallas_src>

<mosaic_0001>
module attributes {stable_mosaic.version = 11 : i64} {
  func.func @probe(%arg0: memref<8x128xf32, #tpu.memory_space<vmem>>, %arg1: memref<8x128xf32, #tpu.memory_space<vmem>>) attributes {dimension_semantics = [], scalar_prefetch = 0 : i64, scratch_operands = 0 : i64, tpu.core_type = #tpu.core_type<tc>} {
    %c0 = arith.constant 0 : index
    %c0_0 = arith.constant 0 : index
    %0 = vector.load %arg0[%c0, %c0_0] : memref<8x128xf32, #tpu.memory_space<vmem>>, vector<8x128xf32>
    %c1_i32 = arith.constant 1 : i32
    %1 = tpu.dynamic_rotate %0 by %c1_i32 dim 1 : vector<8x128xf32>, i32 -> vector<8x128xf32>
    %c0_1 = arith.constant 0 : index
    %c0_2 = arith.constant 0 : index
    %2 = vector.load %arg1[%c0_1, %c0_2] : memref<8x128xf32, #tpu.memory_space<vmem>>, vector<8x128xf32>
    tpu.vector_store %arg1[%c0_1, %c0_2], %1 {strides = array<i32>} : memref<8x128xf32, #tpu.memory_space<vmem>>, vector<8x128xf32>,
    return
  }
}

</mosaic_0001>

<bundles_post_ra>
// kernel: tpu_custom_call.1
= control target key start
LH: loop header
LB: loop body
LE: loop exit
PB: predicated region body
PF: predicated region fallthrough
CT: control target
= control target key end

     0   :  { %6 = vsyncpa [#allocation3], 0  ;;  %s128_s0 = inlined_call_operand.hbm [shape: f32[8,128], index: 0, kind: input, shape index: {}]   ;;  %s129_s1 = inlined_call_operand.hbm [shape: f32[8,128], index: 1, kind: output, shape index: {}]  }
   0x1   :  { %7 = vsyncpa [#allocation4], 0  ;;  %s91_s6 = smov [#allocation2]   ;;  %s43_s10 = scalar_lea.hbm %s128_s0, 128 }
   0x2   :  { %s14_s7 = sshll.u32 %s91_s6, 4  ;;  %p44_p0 = scmp.ne.s32.totalorder %s128_s0, %s43_s10  ;;  %s15_s7 = int_to_ptr.vmem [resolvable:$true] %s14_s7 }
   0x3   :  { %p47_p1 = scmp.lt.u32.totalorder %s43_s10, %s128_s0 }
   0x5   :  { %p49_p2 = pnand %p47_p1, %p44_p0 }
   0x7   :  { %52 = shalt.err (!%p49_p2)
}
   0x8   :  { %s53_s15 = scalar_lea.vmem %s15_s7, 128  ;;  %p58_p4 = scmp.lt.s32.totalorder %s15_s7, %s15_s7 }
   0x9   :  { %p54_p3 = scmp.ne.s32.totalorder %s15_s7, %s53_s15  ;;  %p59_p5 = scmp.lt.s32.totalorder %s53_s15, %s53_s15 }
   0xb   :  { %p60_p6 = por %p59_p5, %p58_p4 }
   0xd   :  { %p61_p7 = pnand %p60_p6, %p54_p3 }
   0xf   :  { %64 = shalt.err (!%p61_p7)
}
  0x10   :  { %17 = dma.hbm_to_vmem [thread:$0]  %s128_s0, 128, %s15_s7, [#allocation3]  }
  0x11   :  { %87 = dma.done.wait [#allocation3], 128  }
  0x12   :  { %88 = vsyncadd [#allocation3], 4294967168  ;;  %v21_v0 = vld [vmem:[#allocation2] sm:$0xff]  ;;  %s92_s18 = smov 1   ;;  %s93_s19 = smov [#allocation5]  }
  0x13   :  { %22 = vrot.lane.b32.xlu0 %v21_v0, %s92_s18  ;;  %s31_s20 = sshll.u32 %s93_s19, 4  ;;  %s32_s20 = int_to_ptr.vmem [resolvable:$true] %s31_s20 }
  0x14   :  { %s65_s21 = scalar_lea.vmem %s32_s20, 128  ;;  %p70_p9 = scmp.lt.s32.totalorder %s32_s20, %s32_s20 }
  0x15   :  { %p66_p8 = scmp.ne.s32.totalorder %s32_s20, %s65_s21  ;;  %p71_p10 = scmp.lt.s32.totalorder %s65_s21, %s65_s21 }
  0x17   :  { %p72_p11 = por %p71_p10, %p70_p9 }
  0x19   :  { %p73_p12 = pnand %p72_p11, %p66_p8 }
  0x85   :  { %v23_v1 = vpop.permute.xlu0 %22 }
  0x86   :  { %24 = vst [vmem:[#allocation5] sm:$0xff] %v23_v1 }
  0x87   :  { %76 = shalt.err (!%p73_p12)
}
  0x88   :  { %s77_s0 = scalar_lea.hbm %s129_s1, 128 }
  0x89   :  { %p78_p13 = scmp.ne.s32.totalorder %s129_s1, %s77_s0  ;;  %p81_p0 = scmp.lt.u32.totalorder %s77_s0, %s129_s1 }
  0x8b   :  { %p83_p1 = pnand %p81_p0, %p78_p13 }
  0x8d   :  { %86 = shalt.err (!%p83_p1)
}
  0x8e   :  { %34 = dma.vmem_to_hbm [thread:$0]  %s32_s20, 128, %s129_s1, [#allocation4]  }
  0x8f   :  { %89 = dma.done.wait [#allocation4], 128  }
  0x90   :  { %90 = vsyncadd [#allocation4], 4294967168 }
  0x91   :  { %38 = vsyncpa [#allocation3], 1 }
  0x92   :  { %39 = vsyncpa [#allocation4], 1 }

</bundles_post_ra>
